<compile_context>
chip_gen: v5e
topology: v5e:2x2
jax: 0.10.0
libtpu: 0.0.40
codegen_flags: <defaults>
</compile_context>

<pallas_src>
import functools

import jax
import jax.numpy as jnp
from jax import lax
from jax.experimental import pallas as pl
from jax.experimental.pallas import tpu as pltpu

TEMPERATURE = 0.07
BASE_TEMPERATURE = 0.07


def _nt_xent_denom_kernel(fn_ref, o_ref, denom_ref, *, tm, tn, inv_t, n_valid, padded):
    """Per row r: accumulate log( sum_{k != r, k < n_valid} exp((sim_rk - 1) / T) ).

    fn_ref    : (N_pad, C) resident L2-normalized features, pre-scaled by sqrt(1/T)
    o_ref     : (tm, 1)    per-row log-denominator (written on the last column block)
    denom_ref : (tm, 1)    f32 running row sums (scratch, persists across the j axis)
    """
    i = pl.program_id(0)              # row block    (parallel across TensorCores)
    j = pl.program_id(1)              # column block (reduction / arbitrary)

    @pl.when(j == 0)
    def _init():
        denom_ref[...] = jnp.zeros_like(denom_ref)

    r0 = pl.multiple_of(i * tm, tm)
    c0 = pl.multiple_of(j * tn, tn)
    row = fn_ref[pl.ds(r0, tm), :]    # (tm, C)
    col = fn_ref[pl.ds(c0, tn), :]    # (tn, C)
    # A @ B.T without transposing the column tile; f32 accumulation on the MXU.
    sim_scaled = lax.dot_general(
        row, col, dimension_numbers=(((1,), (1,)), ((), ())),
        preferred_element_type=jnp.float32)               # (tm, tn) == sim / T

    # Constant, data-independent softmax shift: normalized rows => sim <= 1, exponent <= 0.
    # Temperature is already folded into fn, so no per-element multiply here.
    e = jnp.exp(sim_scaled - inv_t)

    # Only tiles containing the global diagonal (and, if N was padded, the padding tail)
    # pay for masking; every other tile takes the plain-sum branch.
    has_diag = jnp.logical_and(r0 < c0 + tn, r0 + tm > c0)
    if padded:
        needs_mask = jnp.logical_or(has_diag, c0 + tn > n_valid)
    else:
        needs_mask = has_diag

    @pl.when(needs_mask)
    def _masked_sum():
        rr = r0 + lax.broadcasted_iota(jnp.int32, (tm, 1), 0)   # (tm, 1)
        cc = c0 + lax.broadcasted_iota(jnp.int32, (1, tn), 1)   # (1, tn)
        keep = rr != cc                                         # drop self-similarity
        if padded:
            keep = jnp.logical_and(keep, cc < n_valid)          # drop padded columns
        denom_ref[...] += jnp.sum(jnp.where(keep, e, 0.0), axis=1, keepdims=True)

    @pl.when(jnp.logical_not(needs_mask))
    def _plain_sum():
        denom_ref[...] += jnp.sum(e, axis=1, keepdims=True)

    @pl.when(j == pl.num_programs(1) - 1)
    def _finalize():
        o_ref[...] = jnp.log(denom_ref[...])


def _round_up(x, m):
    return ((x + m - 1) // m) * m


def _largest_tile(n, pref, mult):
    """Largest multiple of `mult` that divides n and is <= min(pref, n)."""
    t = (min(pref, n) // mult) * mult
    while t > mult:
        if n % t == 0:
            return t
        t -= mult
    return mult


def nt_xent(feat1, feat2, *, temperature=TEMPERATURE, base_temperature=BASE_TEMPERATURE,
            tm=512, tn=2048, matmul_dtype=jnp.bfloat16):
    """feat1, feat2: (batch, C).  Returns the scalar NT-Xent loss (float32).

    matmul_dtype=bf16 (default) runs the MXU at its bf16 peak on v5e/v6e/v7x; the
    similarity accumulates in f32 and all elementwise/exp/log math is f32 (required on
    v5e anyway).  Pass matmul_dtype=jnp.float32 for bit-closer logits at several-x lower
    MXU throughput.  Expected loss error with bf16 operands is O(1e-2) absolute.
    """
    assert feat1.shape == feat2.shape and feat1.ndim == 2
    b, c = feat1.shape
    n = 2 * b
    inv_t = float(1.0 / temperature)

    # ---- hoisted prologue (runs once, in XLA): normalize + positive-pair logit --------
    f1 = feat1.astype(jnp.float32)
    f2 = feat2.astype(jnp.float32)
    # F.normalize(dim=1, eps=1e-12): x / max(||x||, eps) == x * rsqrt(max(||x||^2, eps^2))
    fn1 = f1 * lax.rsqrt(jnp.maximum(jnp.sum(f1 * f1, axis=1, keepdims=True), 1e-24))
    fn2 = f2 * lax.rsqrt(jnp.maximum(jnp.sum(f2 * f2, axis=1, keepdims=True), 1e-24))
    pos = jnp.sum(fn1 * fn2, axis=1)                           # (b,) positive-pair sim
    pos_logit = (jnp.concatenate([pos, pos]) - 1.0) * inv_t    # (n,)

    # Fold the temperature into the operands: (s*fn) @ (s*fn).T = sim / T with s=sqrt(1/T).
    fn = jnp.concatenate([fn1, fn2], axis=0) * (inv_t ** 0.5)  # (n, c) f32

    # ---- pad N so tn is lane-dense (x128) and tm sublane-aligned (x8) ------------------
    n_pad = _round_up(n, 256)
    padded = n_pad > n
    if padded:
        fn = jnp.pad(fn, ((0, n_pad - n), (0, 0)))
    fn = fn.astype(matmul_dtype)

    tm = _largest_tile(n_pad, tm, 8)
    tn = _largest_tile(n_pad, tn, 128)
    if n_pad // tm < 2:                    # give both TensorCores a row block (v7x megacore)
        tm = _largest_tile(n_pad, n_pad // 2, 8)
    grid = (n_pad // tm, n_pad // tn)

    # VMEM budget derived from the actual footprint (resident fn is double-buffered by the
    # pipeline; sim / exp / mask temporaries are f32 (tm, tn) tiles).  Defaults fit 64 MiB.
    itemsize = jnp.dtype(matmul_dtype).itemsize
    footprint = (2 * n_pad * c * itemsize          # resident normalized features
                 + 6 * tm * tn * 4                 # sim / exp / mask temporaries
                 + 2 * (tm + tn) * c * 4           # row / col operand staging
                 + 8 * tm * 4)                     # denom scratch + output blocks
    vmem_limit_bytes = int(min(max(footprint + (8 << 20), 24 << 20), 120 << 20))
    # TODO(synk): if n_pad*c ever gets too large to keep resident in VMEM, switch the
    # single resident fn input to two gridded (tm, C)/(tn, C) row/column views of fn.

    kernel = functools.partial(
        _nt_xent_denom_kernel, tm=tm, tn=tn, inv_t=inv_t, n_valid=n, padded=padded)

    log_denom = pl.pallas_call(
        kernel,
        out_shape=jax.ShapeDtypeStruct((n_pad, 1), jnp.float32),
        grid_spec=pltpu.PrefetchScalarGridSpec(
            num_scalar_prefetch=0,
            grid=grid,
            in_specs=[
                # Resident, constant block index: DMA'd once, no per-step traffic.
                pl.BlockSpec((n_pad, c), lambda i, j: (0, 0)),
            ],
            out_specs=pl.BlockSpec((tm, 1), lambda i, j: (i, 0)),
            scratch_shapes=[
                pltpu.VMEM((tm, 1), jnp.float32),              # running exp row-sums
            ],
        ),
        compiler_params=pltpu.CompilerParams(
            dimension_semantics=("parallel", "arbitrary"),
            vmem_limit_bytes=vmem_limit_bytes,
        ),
    )(fn)

    # Tiny XLA epilogue: combine with the positive logit, drop padded rows, reduce.
    log_prob = pos_logit - log_denom[:n, 0]
    return -(temperature / base_temperature) * jnp.mean(log_prob)


def _reference(feat1, feat2, temperature=TEMPERATURE, base_temperature=BASE_TEMPERATURE):
    # pure-JAX mirror of the PyTorch module
    features = jnp.concatenate([feat1, feat2], axis=0).astype(jnp.float32)
    b = feat1.shape[0]
    n = 2 * b
    f = features / jnp.maximum(jnp.linalg.norm(features, axis=1, keepdims=True), 1e-12)
    logits = f @ f.T / temperature
    logits = logits - jnp.max(logits, axis=1, keepdims=True)
    diag = jnp.eye(n, dtype=bool)
    denom = jnp.sum(jnp.where(diag, 0.0, jnp.exp(logits)), axis=1)
    idx = (jnp.arange(n) + b) % n
    pos_logit = logits[jnp.arange(n), idx]
    log_prob = pos_logit - jnp.log(denom)
    return -(temperature / base_temperature) * jnp.mean(log_prob)


if __name__ == "__main__":
    key = jax.random.PRNGKey(0)
    k1, k2 = jax.random.split(key)
    batch_size, channels = 4, 32
    feat1 = jax.random.normal(k1, (batch_size, channels), dtype=jnp.float32)
    feat2 = jax.random.normal(k2, (batch_size, channels), dtype=jnp.float32)

    ref = jax.block_until_ready(_reference(feat1, feat2))

    # f32-matmul path: tight check against the reference.
    loss_f32 = jax.block_until_ready(nt_xent(feat1, feat2, matmul_dtype=jnp.float32))
    assert jnp.allclose(loss_f32, ref, rtol=1e-4, atol=1e-4), (loss_f32, ref)

    # default bf16-matmul path: looser tolerance (bf16 operand rounding divided by T).
    loss_bf16 = jax.block_until_ready(nt_xent(feat1, feat2))
    assert jnp.allclose(loss_bf16, ref, rtol=5e-2, atol=5e-2), (loss_bf16, ref)

    print("KERNEL_OK")
</pallas_src>

<mosaic_0001>
module attributes {stable_mosaic.version = 11 : i64} {
  func.func @_nt_xent_denom_kernel(%arg0: i32, %arg1: i32, %arg2: memref<256x32xf32, #tpu.memory_space<vmem>>, %arg3: memref<128x1xf32, #tpu.memory_space<vmem>>, %arg4: memref<128x1xf32, #tpu.memory_space<vmem>>) attributes {dimension_semantics = [#tpu.dimension_semantics<parallel>, #tpu.dimension_semantics<arbitrary>], iteration_bounds = array<i64: 2, 1>, scalar_prefetch = 0 : i64, scratch_operands = 1 : i64, tpu.core_type = #tpu.core_type<tc>, window_params = [{pipeline_mode = #tpu.pipeline_mode<synchronous>, transform_indices = @transform_0, window_bounds = array<i64: 256, 32>}, {transform_indices = @transform_1, window_bounds = array<i64: 128, 1>}]} {
    %c0_i32 = arith.constant 0 : i32
    %0 = arith.cmpi eq, %arg1, %c0_i32 : i32
    %1 = arith.extui %0 : i1 to i32
    %c0_i32_0 = arith.constant 0 : i32
    %2 = arith.cmpi ne, %1, %c0_i32_0 : i32
    scf.if %2 {
      %cst_10 = arith.constant 0.000000e+00 : f32
      %31 = vector.broadcast %cst_10 : f32 to vector<128x1xf32>
      %c0_11 = arith.constant 0 : index
      %c0_12 = arith.constant 0 : index
      %32 = vector.load %arg4[%c0_11, %c0_12] : memref<128x1xf32, #tpu.memory_space<vmem>>, vector<128x1xf32>
      tpu.vector_store %arg4[%c0_11, %c0_12], %31 {strides = array<i32>} : memref<128x1xf32, #tpu.memory_space<vmem>>, vector<128x1xf32>,
    } else {
    }
    %c128_i32 = arith.constant 128 : i32
    %3 = arith.muli %arg0, %c128_i32 : i32
    %4 = tpu.assume_multiple %3, 128 : i32
    %c256_i32 = arith.constant 256 : i32
    %5 = arith.muli %arg1, %c256_i32 : i32
    %6 = tpu.assume_multiple %5, 256 : i32
    %7 = arith.index_cast %4 : i32 to index
    %c0 = arith.constant 0 : index
    %8 = vector.load %arg2[%7, %c0] : memref<256x32xf32, #tpu.memory_space<vmem>>, vector<128x32xf32>
    %9 = arith.index_cast %6 : i32 to index
    %c0_1 = arith.constant 0 : index
    %10 = vector.load %arg2[%9, %c0_1] : memref<256x32xf32, #tpu.memory_space<vmem>>, vector<256x32xf32>
    %cst = arith.constant dense<0.000000e+00> : vector<128x256xf32>
    %11 = tpu.matmul %8, %10, %cst {dimension_numbers = #tpu.dot_dimension_numbers<[1], [1], [0], [0], [0, 0, 1, 0], [], []>} : vector<128x32xf32>, vector<256x32xf32>, vector<128x256xf32> -> vector<128x256xf32>
    %cst_2 = arith.constant 14.2857141 : f32
    %12 = vector.broadcast %cst_2 : f32 to vector<128x256xf32>
    %13 = arith.subf %11, %12 : vector<128x256xf32>
    %14 = math.exp %13 : vector<128x256xf32>
    %c256_i32_3 = arith.constant 256 : i32
    %15 = arith.addi %6, %c256_i32_3 : i32
    %16 = arith.cmpi slt, %4, %15 : i32
    %c128_i32_4 = arith.constant 128 : i32
    %17 = arith.addi %4, %c128_i32_4 : i32
    %18 = arith.cmpi sgt, %17, %6 : i32
    %19 = arith.andi %16, %18 : i1
    %c256_i32_5 = arith.constant 256 : i32
    %20 = arith.addi %6, %c256_i32_5 : i32
    %c8_i32 = arith.constant 8 : i32
    %21 = arith.cmpi sgt, %20, %c8_i32 : i32
    %22 = arith.ori %19, %21 : i1
    %23 = arith.extui %22 : i1 to i32
    %c0_i32_6 = arith.constant 0 : i32
    %24 = arith.cmpi ne, %23, %c0_i32_6 : i32
    scf.if %24 {
      %31 = tpu.iota {dimensions = array<i32: 0>} : vector<128x1xi32>
      %32 = vector.broadcast %4 : i32 to vector<128x1xi32>
      %33 = arith.addi %32, %31 : vector<128x1xi32>
      %34 = tpu.iota {dimensions = array<i32: 1>} : vector<1x256xi32>
      %35 = vector.broadcast %6 : i32 to vector<1x256xi32>
      %36 = arith.addi %35, %34 : vector<1x256xi32>
      %37 = vector.broadcast %33 : vector<128x1xi32> to vector<128x256xi32>
      %38 = vector.broadcast %36 : vector<1x256xi32> to vector<128x256xi32>
      %39 = arith.cmpi ne, %37, %38 : vector<128x256xi32>
      %c8_i32_10 = arith.constant 8 : i32
      %40 = vector.broadcast %c8_i32_10 : i32 to vector<1x256xi32>
      %41 = arith.cmpi slt, %36, %40 : vector<1x256xi32>
      %42 = vector.broadcast %41 : vector<1x256xi1> to vector<128x256xi1>
      %43 = arith.andi %39, %42 : vector<128x256xi1>
      %c0_11 = arith.constant 0 : index
      %c0_12 = arith.constant 0 : index
      %44 = vector.load %arg4[%c0_11, %c0_12] : memref<128x1xf32, #tpu.memory_space<vmem>>, vector<128x1xf32>
      %cst_13 = arith.constant 0.000000e+00 : f32
      %45 = vector.broadcast %cst_13 : f32 to vector<128x256xf32>
      %46 = arith.select %43, %14, %45 : vector<128x256xi1>, vector<128x256xf32>
      %cst_14 = arith.constant dense<0.000000e+00> : vector<128xf32>
      %47 = vector.multi_reduction <add>, %46, %cst_14 [1] : vector<128x256xf32> to vector<128xf32>
      %48 = vector.shape_cast %47 : vector<128xf32> to vector<128x1xf32>
      %49 = arith.addf %44, %48 : vector<128x1xf32>
      %c0_15 = arith.constant 0 : index
      %c0_16 = arith.constant 0 : index
      %50 = vector.load %arg4[%c0_15, %c0_16] : memref<128x1xf32, #tpu.memory_space<vmem>>, vector<128x1xf32>
      tpu.vector_store %arg4[%c0_15, %c0_16], %49 {strides = array<i32>} : memref<128x1xf32, #tpu.memory_space<vmem>>, vector<128x1xf32>,
    } else {
    }
    %true = arith.constant true
    %25 = arith.xori %22, %true : i1
    %26 = arith.extui %25 : i1 to i32
    %c0_i32_7 = arith.constant 0 : i32
    %27 = arith.cmpi ne, %26, %c0_i32_7 : i32
    scf.if %27 {
      %c0_10 = arith.constant 0 : index
      %c0_11 = arith.constant 0 : index
      %31 = vector.load %arg4[%c0_10, %c0_11] : memref<128x1xf32, #tpu.memory_space<vmem>>, vector<128x1xf32>
      %cst_12 = arith.constant dense<0.000000e+00> : vector<128xf32>
      %32 = vector.multi_reduction <add>, %14, %cst_12 [1] : vector<128x256xf32> to vector<128xf32>
      %33 = vector.shape_cast %32 : vector<128xf32> to vector<128x1xf32>
      %34 = arith.addf %31, %33 : vector<128x1xf32>
      %c0_13 = arith.constant 0 : index
      %c0_14 = arith.constant 0 : index
      %35 = vector.load %arg4[%c0_13, %c0_14] : memref<128x1xf32, #tpu.memory_space<vmem>>, vector<128x1xf32>
      tpu.vector_store %arg4[%c0_13, %c0_14], %34 {strides = array<i32>} : memref<128x1xf32, #tpu.memory_space<vmem>>, vector<128x1xf32>,
    } else {
    }
    %c0_i32_8 = arith.constant 0 : i32
    %28 = arith.cmpi eq, %arg1, %c0_i32_8 : i32
    %29 = arith.extui %28 : i1 to i32
    %c0_i32_9 = arith.constant 0 : i32
    %30 = arith.cmpi ne, %29, %c0_i32_9 : i32
    scf.if %30 {
      %c0_10 = arith.constant 0 : index
      %c0_11 = arith.constant 0 : index
      %31 = vector.load %arg4[%c0_10, %c0_11] : memref<128x1xf32, #tpu.memory_space<vmem>>, vector<128x1xf32>
      %32 = math.log %31 : vector<128x1xf32>
      %c0_12 = arith.constant 0 : index
      %c0_13 = arith.constant 0 : index
      %33 = vector.load %arg3[%c0_12, %c0_13] : memref<128x1xf32, #tpu.memory_space<vmem>>, vector<128x1xf32>
      tpu.vector_store %arg3[%c0_12, %c0_13], %32 {strides = array<i32>} : memref<128x1xf32, #tpu.memory_space<vmem>>, vector<128x1xf32>,
    } else {
    }
    return
  }
  func.func @transform_0(%arg0: i32, %arg1: i32) -> (i32, i32) {
    %c0_i32 = arith.constant 0 : i32
    %c0_i32_0 = arith.constant 0 : i32
    %c0_i32_1 = arith.constant 0 : i32
    return %c0_i32, %c0_i32_0 : i32, i32
  }
  func.func @transform_1(%arg0: i32, %arg1: i32) -> (i32, i32) {
    %c0_i32 = arith.constant 0 : i32
    %c0_i32_0 = arith.constant 0 : i32
    return %arg0, %c0_i32 : i32, i32
  }
}

</mosaic_0001>

<bundles_post_ra>
// kernel: tpu_custom_call.1
= control target key start
LH: loop header
LB: loop body
LE: loop exit
PB: predicated region body
PF: predicated region fallthrough
CT: control target
= control target key end

     0   :  { %s1290_s6 = smov 0   ;;  %s1292_s7 = smov 0   ;;  %s1776_s0 = inlined_call_operand.vmem [shape: f32[256,32], index: 0, kind: input, shape index: {}]   ;;  %s1777_s1 = inlined_call_operand.vmem [shape: f32[256,1], index: 1, kind: output, shape index: {}]  }
   0x1   :  { %s1294_s8 = smov 0  }
   0x2 LB: > { %s23_s9 = sadd.s32 1, %s1273_s7  ;;  %p1032_p0 = scmp.ge.s32.totalorder %s1277_s8, 1  ;;  %s1277_s8 = sphi %s1294_s8, %s11_s8   ;;  %s1273_s7 = sphi %s1292_s7, %s1785_s7   ;;  %s1269_s6 = sphi %s1290_s6, %s1784_s6  }
   0x3   : > { %p25_p1 = scmp.ge.s32.totalorder %s23_s9, 2  ;;  %p89_p2 = scmp.lt.s32.totalorder %s1277_s8, 3 }
   0x5   : > { %s1787_s9 = smov (%p25_p1, %s23_s9), 0  ;;  %p90_p3 = pnand %p1032_p0, %p89_p2 }
   0x6   : > { %s1035_s15 = sshll.u32 (!%p90_p3), %s1269_s6, 7 }
   0x7   : > { %93 = sbr.rel (%p90_p3) target bundleno = 414 (0x19e), region = 24  ;;  %s1394_s20 = scalar_lea.vmem (!%p90_p3), %s1776_s0, %s1035_s15 }
   0xc   : > { %v166_v0 = vld [vmem:[%s1776_s0 + $0x78] sm:$0xff]  ;;  %vm183_vm0 = vcmask 261120   ;;  %v165_v1 = vld [vmem:[%s1776_s0 + $0x70] sm:$0xff]  ;;  %v164_v2 = vld [vmem:[%s1776_s0 + $0x68] sm:$0xff]  ;;  %v565_v48 = vlaneseq  ;;  %v1566_v50 = vstv %s1035_s15  ;;  %s1033_s15 = sshll.u32 %s1269_s6, 4 }
   0xd   : > { %1036 = vmatpush.xpose.msk.msra.mxu0 %vm183_vm0, %v166_v0  ;;  %1134 = vmatpush.xpose.msk.msra.mxu2 %vm183_vm0, %v166_v0  ;;  %v163_v3 = vld [vmem:[%s1776_s0 + $0x60] sm:$0xff]  ;;  %v162_v4 = vld [vmem:[%s1776_s0 + $0x58] sm:$0xff]  ;;  %v161_v5 = vld [vmem:[%s1776_s0 + $0x50] sm:$0xff]  ;;  %p105_p4 = scmp.lt.s32.totalorder %s1033_s15, 31 }
   0xe   : > { %v160_v6 = vld [vmem:[%s1776_s0 + $0x48] sm:$0xff]  ;;  %v159_v7 = vld [vmem:[%s1776_s0 + $0x40] sm:$0xff]  ;;  %v158_v8 = vld [vmem:[%s1776_s0 + $0x38] sm:$0xff]  ;;  %v1562_v49 = vshrl.u32 %v565_v48, 7  ;;  %v1574_v54 = vand.u32 127, %v565_v48 }
   0xf   : > { %v157_v9 = vld [vmem:[%s1776_s0 + $0x30] sm:$0xff]  ;;  %v156_v10 = vld [vmem:[%s1776_s0 + $0x28] sm:$0xff]  ;;  %v155_v11 = vld [vmem:[%s1776_s0 + $0x20] sm:$0xff]  ;;  %s1789_s15 = smov (!%p105_p4, %s1033_s15), 31 }
  0x10   : > { %v154_v12 = vld [vmem:[%s1776_s0 + $0x18] sm:$0xff]  ;;  %v153_v13 = vld [vmem:[%s1776_s0 + $0x10] sm:$0xff]  ;;  %v152_v14 = vld [vmem:[%s1776_s0 + $0x8] sm:$0xff]  ;;  %v583_v53 = vadd.s32 %v1566_v50, %v1562_v49  ;;  %v574_v56 = vadd.s32 64, %v1562_v49  ;;  %vm637_vm2 = vcmp.lt.s32.totalorder %v1574_v54, 8  ;;  %v567_v58 = vadd.s32 8, %v1562_v49 }
  0x11   : > { %1037 = vmatpush.xpose.msk.msra.mxu0 %vm183_vm0, %v165_v1  ;;  %1135 = vmatpush.xpose.msk.msra.mxu2 %vm183_vm0, %v165_v1  ;;  %v151_v15 = vld [vmem:[%s1776_s0] sm:$0xff]  ;;  %v1409_v18 = vld [vmem:[%s1394_s20 + $0x8] sm:$0xff]  ;;  %v1419_v20 = vld [vmem:[%s1394_s20 + $0x10] sm:$0xff]  ;;  %s1034_s6 = sshll.u32 %s1789_s15, 3 }
  0x12   : > { %v1399_v16 = vld [vmem:[%s1394_s20] sm:$0xff]  ;;  %v1412_v19 = vld [vmem:[%s1394_s20 + $0x48] sm:$0xff]  ;;  %v1422_v21 = vld [vmem:[%s1394_s20 + $0x50] sm:$0xff]  ;;  %vm605_vm1 = vcmp.ne.s32.totalorder %v583_v53, %v1574_v54  ;;  %v591_v61 = vadd.s32 %v1566_v50, %v574_v56  ;;  %v584_v0 = vadd.s32 %v1566_v50, %v567_v58  ;;  %v578_v56 = vadd.s32 96, %v1562_v49  ;;  %s1720_s2 = scalar_lea.vmem %s1777_s1, %s1034_s6 }
  0x13   : > { %v1402_v17 = vld [vmem:[%s1394_s20 + $0x40] sm:$0xff]  ;;  %v1429_v22 = vld [vmem:[%s1394_s20 + $0x18] sm:$0xff]  ;;  %v181_v25 = vld [vmem:[%s1776_s0 + $0xf0] sm:$0xff] }
  0x14   : > { %v1432_v23 = vld [vmem:[%s1394_s20 + $0x58] sm:$0xff]  ;;  %v1447_v26 = vld [vmem:[%s1394_s20 + $0x20] sm:$0xff]  ;;  %v180_v28 = vld [vmem:[%s1776_s0 + $0xe8] sm:$0xff]  ;;  %vm621_vm4 = vcmp.ne.s32.totalorder %v591_v61, %v1574_v54  ;;  %vm607_vm5 = vcmp.ne.s32.totalorder %v584_v0, %v1574_v54  ;;  %v595_v61 = vadd.s32 %v1566_v50, %v578_v56 }
  0x15   : > { %1038 = vmatpush.xpose.msk.msra.mxu0 %vm183_vm0, %v164_v2  ;;  %1136 = vmatpush.xpose.msk.msra.mxu2 %vm183_vm0, %v164_v2  ;;  %v182_v24 = vld [vmem:[%s1776_s0 + $0xf8] sm:$0xff]  ;;  %v1450_v27 = vld [vmem:[%s1394_s20 + $0x60] sm:$0xff]  ;;  %v1467_v30 = vld [vmem:[%s1394_s20 + $0x28] sm:$0xff] }
  0x16   : > { %1150 = vmatpush.xpose.msk.msra.mxu3 %vm183_vm0, %v182_v24  ;;  %1068 = vmatpush.xpose.msk.msra.mxu1 %vm183_vm0, %v182_v24  ;;  %v179_v29 = vld [vmem:[%s1776_s0 + $0xe0] sm:$0xff]  ;;  %v1470_v31 = vld [vmem:[%s1394_s20 + $0x68] sm:$0xff]  ;;  %v178_v32 = vld [vmem:[%s1776_s0 + $0xd8] sm:$0xff] }
  0x17   : > { %v177_v33 = vld [vmem:[%s1776_s0 + $0xd0] sm:$0xff]  ;;  %v176_v36 = vld [vmem:[%s1776_s0 + $0xc8] sm:$0xff]  ;;  %v175_v37 = vld [vmem:[%s1776_s0 + $0xc0] sm:$0xff] }
  0x18   : > { %v1487_v34 = vld [vmem:[%s1394_s20 + $0x30] sm:$0xff]  ;;  %v1507_v38 = vld [vmem:[%s1394_s20 + $0x38] sm:$0xff]  ;;  %v172_v42 = vld [vmem:[%s1776_s0 + $0xa8] sm:$0xff] }
  0x19   : > { %1039 = vmatpush.xpose.msk.msra.mxu0 %vm183_vm0, %v163_v3  ;;  %1137 = vmatpush.xpose.msk.msra.mxu2 %vm183_vm0, %v163_v3  ;;  %v1490_v35 = vld [vmem:[%s1394_s20 + $0x70] sm:$0xff]  ;;  %v1510_v39 = vld [vmem:[%s1394_s20 + $0x78] sm:$0xff]  ;;  %v171_v43 = vld [vmem:[%s1776_s0 + $0xa0] sm:$0xff] }
  0x1a   : > { %1151 = vmatpush.xpose.msk.msra.mxu3 %vm183_vm0, %v181_v25  ;;  %1069 = vmatpush.xpose.msk.msra.mxu1 %vm183_vm0, %v181_v25  ;;  %v174_v40 = vld [vmem:[%s1776_s0 + $0xb8] sm:$0xff]  ;;  %v173_v41 = vld [vmem:[%s1776_s0 + $0xb0] sm:$0xff]  ;;  %v168_v46 = vld [vmem:[%s1776_s0 + $0x88] sm:$0xff] }
  0x1b   : > { %v170_v44 = vld [vmem:[%s1776_s0 + $0x98] sm:$0xff]  ;;  %v169_v45 = vld [vmem:[%s1776_s0 + $0x90] sm:$0xff]  ;;  %v167_v47 = vld [vmem:[%s1776_s0 + $0x80] sm:$0xff] }
  0x1c   : > { %vm643_vm3 = vmand %vm605_vm1, %vm637_vm2 }
  0x1d   : > { %1040 = vmatpush.xpose.msk.msra.mxu0 %vm183_vm0, %v162_v4  ;;  %1138 = vmatpush.xpose.msk.msra.mxu2 %vm183_vm0, %v162_v4  ;;  %v575_v4 = vadd.s32 72, %v1562_v49  ;;  %vm659_vm6 = vmand %vm621_vm4, %vm637_vm2 }
  0x1e   : > { %1152 = vmatpush.xpose.msk.msra.mxu3 %vm183_vm0, %v180_v28  ;;  %1070 = vmatpush.xpose.msk.msra.mxu1 %vm183_vm0, %v180_v28  ;;  %vm645_vm7 = vmand %vm607_vm5, %vm637_vm2 }
  0x21   : > { %1041 = vmatpush.xpose.msk.msra.mxu0 %vm183_vm0, %v161_v5  ;;  %1139 = vmatpush.xpose.msk.msra.mxu2 %vm183_vm0, %v161_v5 }
  0x22   : > { %1153 = vmatpush.xpose.msk.msra.mxu3 %vm183_vm0, %v179_v29  ;;  %1071 = vmatpush.xpose.msk.msra.mxu1 %vm183_vm0, %v179_v29 }
  0x25   : > { %1042 = vmatpush.xpose.msk.msra.mxu0 %vm183_vm0, %v160_v6  ;;  %1140 = vmatpush.xpose.msk.msra.mxu2 %vm183_vm0, %v160_v6  ;;  %v568_v6 = vadd.s32 16, %v1562_v49 }
  0x26   : > { %1154 = vmatpush.xpose.msk.msra.mxu3 %vm183_vm0, %v178_v32  ;;  %1072 = vmatpush.xpose.msk.msra.mxu1 %vm183_vm0, %v178_v32 }
  0x29   : > { %1043 = vmatpush.xpose.msk.msra.mxu0 %vm183_vm0, %v159_v7  ;;  %1141 = vmatpush.xpose.msk.msra.mxu2 %vm183_vm0, %v159_v7 }
  0x2a   : > { %1155 = vmatpush.xpose.msk.msra.mxu3 %vm183_vm0, %v177_v33  ;;  %1073 = vmatpush.xpose.msk.msra.mxu1 %vm183_vm0, %v177_v33 }
  0x2d   : > { %1044 = vmatpush.xpose.msk.msra.mxu0 %vm183_vm0, %v158_v8  ;;  %1142 = vmatpush.xpose.msk.msra.mxu2 %vm183_vm0, %v158_v8 }
  0x2e   : > { %1156 = vmatpush.xpose.msk.msra.mxu3 %vm183_vm0, %v176_v36  ;;  %1074 = vmatpush.xpose.msk.msra.mxu1 %vm183_vm0, %v176_v36 }
  0x31   : > { %1045 = vmatpush.xpose.msk.msra.mxu0 %vm183_vm0, %v157_v9  ;;  %1143 = vmatpush.xpose.msk.msra.mxu2 %vm183_vm0, %v157_v9  ;;  %v592_v9 = vadd.s32 %v1566_v50, %v575_v4 }
  0x32   : > { %1157 = vmatpush.xpose.msk.msra.mxu3 %vm183_vm0, %v175_v37  ;;  %1075 = vmatpush.xpose.msk.msra.mxu1 %vm183_vm0, %v175_v37 }
  0x33   : > { %vm623_vm8 = vcmp.ne.s32.totalorder %v592_v9, %v1574_v54 }
  0x34   : > { %vm1608_vm10 = vmand %vm623_vm8, %vm637_vm2 }
  0x35   : > { %1046 = vmatpush.xpose.msk.msra.mxu0 %vm183_vm0, %v156_v10  ;;  %1144 = vmatpush.xpose.msk.msra.mxu2 %vm183_vm0, %v156_v10 }
  0x36   : > { %1158 = vmatpush.xpose.msk.msra.mxu3 %vm183_vm0, %v174_v40  ;;  %1076 = vmatpush.xpose.msk.msra.mxu1 %vm183_vm0, %v174_v40  ;;  %v577_v40 = vadd.s32 88, %v1562_v49 }
  0x39   : > { %1047 = vmatpush.xpose.msk.msra.mxu0 %vm183_vm0, %v155_v11  ;;  %1145 = vmatpush.xpose.msk.msra.mxu2 %vm183_vm0, %v155_v11 }
  0x3a   : > { %1159 = vmatpush.xpose.msk.msra.mxu3 %vm183_vm0, %v173_v41  ;;  %1077 = vmatpush.xpose.msk.msra.mxu1 %vm183_vm0, %v173_v41 }
  0x3d   : > { %1048 = vmatpush.xpose.msk.msra.mxu0 %vm183_vm0, %v154_v12  ;;  %1146 = vmatpush.xpose.msk.msra.mxu2 %vm183_vm0, %v154_v12 }
  0x3e   : > { %1160 = vmatpush.xpose.msk.msra.mxu3 %vm183_vm0, %v172_v42  ;;  %1078 = vmatpush.xpose.msk.msra.mxu1 %vm183_vm0, %v172_v42  ;;  %v569_v42 = vadd.s32 24, %v1562_v49 }
  0x40   : > { %v586_v53 = vadd.s32 %v1566_v50, %v569_v42 }
  0x41   : > { %1049 = vmatpush.xpose.msk.msra.mxu0 %vm183_vm0, %v153_v13  ;;  %1147 = vmatpush.xpose.msk.msra.mxu2 %vm183_vm0, %v153_v13 }
  0x42   : > { %1161 = vmatpush.xpose.msk.msra.mxu3 %vm183_vm0, %v171_v43  ;;  %1079 = vmatpush.xpose.msk.msra.mxu1 %vm183_vm0, %v171_v43 }
  0x45   : > { %1050 = vmatpush.xpose.msk.msra.mxu0 %vm183_vm0, %v152_v14  ;;  %1148 = vmatpush.xpose.msk.msra.mxu2 %vm183_vm0, %v152_v14  ;;  %v585_v14 = vadd.s32 %v1566_v50, %v568_v6 }
  0x46   : > { %1162 = vmatpush.xpose.msk.msra.mxu3 %vm183_vm0, %v170_v44  ;;  %1080 = vmatpush.xpose.msk.msra.mxu1 %vm183_vm0, %v170_v44 }
  0x47   : > { %vm609_vm9 = vcmp.ne.s32.totalorder %v585_v14, %v1574_v54  ;;  %v580_v14 = vadd.s32 112, %v1562_v49 }
  0x48   : > { %vm647_vm11 = vmand %vm609_vm9, %vm637_vm2 }
  0x49   : > { %1051 = vmatpush.xpose.msk.msra.mxu0 %vm183_vm0, %v151_v15  ;;  %1149 = vmatpush.xpose.msk.msra.mxu2 %vm183_vm0, %v151_v15 }
  0x4a   : > { %1163 = vmatpush.xpose.msk.msra.mxu3 %vm183_vm0, %v169_v45  ;;  %1081 = vmatpush.xpose.msk.msra.mxu1 %vm183_vm0, %v169_v45 }
  0x4c   : > { %1052 = vmatmul.msk.f32.vlgmr.msra.gmra.mxu0 %vm183_vm0, %v1399_v16  ;;  %1060 = vmatmul.msk.f32.vlgmr.msra.gmra.mxu2 %vm183_vm0, %v1402_v17 }
  0x4e   : > { %1164 = vmatpush.xpose.msk.msra.mxu3 %vm183_vm0, %v168_v46  ;;  %1082 = vmatpush.xpose.msk.msra.mxu1 %vm183_vm0, %v168_v46  ;;  %v594_v46 = vadd.s32 %v1566_v50, %v577_v40 }
  0x50   : > { %vm627_vm1 = vcmp.ne.s32.totalorder %v594_v46, %v1574_v54  ;;  %v1279_v46 = vmov 0.0  }
  0x51   : > { %vm665_vm4 = vmand %vm627_vm1, %vm637_vm2 }
  0x52   : > { %1165 = vmatpush.xpose.msk.msra.mxu3 %vm183_vm0, %v167_v47  ;;  %1083 = vmatpush.xpose.msk.msra.mxu1 %vm183_vm0, %v167_v47 }
  0x54   : > { %1053 = vmatmul.msk.f32.gmra.mxu0 %vm183_vm0, %v1409_v18  ;;  %1061 = vmatmul.msk.f32.gmra.mxu2 %vm183_vm0, %v1412_v19 }
  0x55   : > { %1092 = vmatmul.msk.f32.vlgmr.msra.gmra.mxu3 %vm183_vm0, %v1402_v17  ;;  %1084 = vmatmul.msk.f32.vlgmr.msra.gmra.mxu1 %vm183_vm0, %v1399_v16 }
  0x5c   : > { %1054 = vmatmul.msk.f32.gmra.mxu0 %vm183_vm0, %v1419_v20  ;;  %1062 = vmatmul.msk.f32.gmra.mxu2 %vm183_vm0, %v1422_v21 }
  0x5d   : > { %1093 = vmatmul.msk.f32.gmra.mxu3 %vm183_vm0, %v1412_v19  ;;  %1085 = vmatmul.msk.f32.gmra.mxu1 %vm183_vm0, %v1409_v18  ;;  %v576_v18 = vadd.s32 80, %v1562_v49 }
  0x5f   : > { %v593_v24 = vadd.s32 %v1566_v50, %v576_v18  ;;  %v597_v18 = vadd.s32 %v1566_v50, %v580_v14 }
  0x61   : > { %vm625_vm13 = vcmp.ne.s32.totalorder %v593_v24, %v1574_v54 }
  0x62   : > { %vm1634_vm15 = vmand %vm625_vm13, %vm637_vm2  ;;  %vm633_vm13 = vcmp.ne.s32.totalorder %v597_v18, %v1574_v54 }
  0x63   : > { %vm671_vm1 = vmand %vm633_vm13, %vm637_vm2 }
  0x64   : > { %1055 = vmatmul.msk.f32.gmra.mxu0 %vm183_vm0, %v1429_v22  ;;  %1063 = vmatmul.msk.f32.gmra.mxu2 %vm183_vm0, %v1432_v23 }
  0x65   : > { %1094 = vmatmul.msk.f32.gmra.mxu3 %vm183_vm0, %v1422_v21  ;;  %1086 = vmatmul.msk.f32.gmra.mxu1 %vm183_vm0, %v1419_v20  ;;  %v579_v20 = vadd.s32 104, %v1562_v49 }
  0x67   : > { %v596_v25 = vadd.s32 %v1566_v50, %v579_v20 }
  0x69   : > { %vm631_vm12 = vcmp.ne.s32.totalorder %v596_v25, %v1574_v54 }
  0x6a   : > { %vm1627_vm14 = vmand %vm631_vm12, %vm637_vm2 }
  0x6c   : > { %1056 = vmatmul.msk.f32.gmra.mxu0 %vm183_vm0, %v1447_v26  ;;  %1064 = vmatmul.msk.f32.gmra.mxu2 %vm183_vm0, %v1450_v27 }
  0x6d   : > { %1095 = vmatmul.msk.f32.gmra.mxu3 %vm183_vm0, %v1432_v23  ;;  %1087 = vmatmul.msk.f32.gmra.mxu1 %vm183_vm0, %v1429_v22 }
  0x74   : > { %1057 = vmatmul.msk.f32.gmra.mxu0 %vm183_vm0, %v1467_v30  ;;  %1065 = vmatmul.msk.f32.gmra.mxu2 %vm183_vm0, %v1470_v31 }
  0x75   : > { %1096 = vmatmul.msk.f32.gmra.mxu3 %vm183_vm0, %v1450_v27  ;;  %1088 = vmatmul.msk.f32.gmra.mxu1 %vm183_vm0, %v1447_v26 }
  0x7c   : > { %1058 = vmatmul.msk.f32.gmra.mxu0 %vm183_vm0, %v1487_v34  ;;  %1066 = vmatmul.msk.f32.gmra.mxu2 %vm183_vm0, %v1490_v35 }
  0x7d   : > { %1097 = vmatmul.msk.f32.gmra.mxu3 %vm183_vm0, %v1470_v31  ;;  %1089 = vmatmul.msk.f32.gmra.mxu1 %vm183_vm0, %v1467_v30 }
  0x84   : > { %1059 = vmatmul.msk.f32.gmra.mxu0 %vm183_vm0, %v1507_v38  ;;  %1067 = vmatmul.msk.f32.gmra.mxu2 %vm183_vm0, %v1510_v39 }
  0x85   : > { %1098 = vmatmul.msk.f32.gmra.mxu3 %vm183_vm0, %v1490_v35  ;;  %1090 = vmatmul.msk.f32.gmra.mxu1 %vm183_vm0, %v1487_v34  ;;  %v572_v35 = vadd.s32 48, %v1562_v49 }
  0x8d   : > { %1099 = vmatmul.msk.f32.gmra.mxu3 %vm183_vm0, %v1510_v39  ;;  %1091 = vmatmul.msk.f32.gmra.mxu1 %vm183_vm0, %v1507_v38  ;;  %v573_v39 = vadd.s32 56, %v1562_v49 }
  0xc9   : > { %v345_v51 = vpop.f32.mrf.mxu0 }
  0xca   : > { %v1100_v52 = vadd.f32 -14.285714, %v345_v51 }
  0xcc   : > { %v490_v55 = vmul.f32 1.442695, %v1100_v52 }
  0xce   : > { %1191 = vpow2.f32 %v490_v55  ;;  %v570_v55 = vadd.s32 32, %v1562_v49 }
  0xcf   : > { %v369_v57 = vpop.f32.mrf.mxu2 }
  0xd0   : > { %v1116_v59 = vadd.f32 -14.285714, %v369_v57  ;;  %v587_v30 = vadd.s32 %v1566_v50, %v570_v55 }
  0xd1   : > { %v348_v60 = vpop.f32.mrf.mxu0 }
  0xd2   : > { %v522_v62 = vmul.f32 1.442695, %v1116_v59  ;;  %v1102_v63 = vadd.f32 -14.285714, %v348_v60 }
  0xd4   : > { %v1192_v1 = vpop.eup %1191  ;;  %1193 = vpow2.f32 %v522_v62  ;;  %v494_v2 = vmul.f32 1.442695, %v1102_v63 }
  0xd5   : > { %v691_v3 = vsel %vm643_vm3, %v1192_v1, 0.0  ;;  %vm611_vm3 = vcmp.ne.s32.totalorder %v586_v53, %v1574_v54 }
  0xd6   : > { %1195 = vpow2.f32 %v494_v2  ;;  %724 = vadd.xlane.f32.xlu0 %v691_v3  ;;  %vm649_vm5 = vmand %vm611_vm3, %vm637_vm2  ;;  %v571_v3 = vadd.s32 40, %v1562_v49 }
  0xd7   : > { %v372_v5 = vpop.f32.mrf.mxu2 }
  0xd8   : > { %v1118_v7 = vadd.f32 -14.285714, %v372_v5  ;;  %v434_v27 = vpop.f32.mrf.mxu3 }
  0xd9   : > { %v351_v8 = vpop.f32.mrf.mxu0 }
  0xda   : > { %v1194_v10 = vpop.eup %1193  ;;  %v526_v11 = vmul.f32 1.442695, %v1118_v7  ;;  %v1104_v12 = vadd.f32 -14.285714, %v351_v8  ;;  %v588_v7 = vadd.s32 %v1566_v50, %v571_v3 }
  0xdb   : > { %v707_v13 = vsel %vm659_vm6, %v1194_v10, 0.0  ;;  %vm613_vm6 = vcmp.ne.s32.totalorder %v587_v30, %v1574_v54 }
  0xdc   : > { %v1196_v15 = vpop.eup %1195  ;;  %1197 = vpow2.f32 %v526_v11  ;;  %v498_v16 = vmul.f32 1.442695, %v1104_v12  ;;  %748 = vadd.xlane.f32.xlu2 %v707_v13  ;;  %vm651_vm8 = vmand %vm613_vm6, %vm637_vm2  ;;  %v589_v12 = vadd.s32 %v1566_v50, %v572_v35  ;;  %vm114_vm6 = vcmask 7168  }
  0xdd   : > { %v693_v17 = vsel %vm645_vm7, %v1196_v15, 0.0  ;;  %vm629_vm7 = vcmp.ne.s32.totalorder %v595_v61, %v1574_v54  ;;  %115 = vst.msk [vmem:[#allocation2] sm:$0xff] %vm114_vm6, %v1279_v46 }
  0xde   : > { %1199 = vpow2.f32 %v498_v16  ;;  %727 = vadd.xlane.f32.xlu0 %v693_v17  ;;  %vm667_vm9 = vmand %vm629_vm7, %vm637_vm2  ;;  %116 = vst.msk [vmem:[#allocation2 + $0x8] sm:$0xff] %vm114_vm6, %v1279_v46 }
  0xdf   : > { %v375_v19 = vpop.f32.mrf.mxu2  ;;  %117 = vst.msk [vmem:[#allocation2 + $0x10] sm:$0xff] %vm114_vm6, %v1279_v46 }
  0xe0   : > { %v1120_v21 = vadd.f32 -14.285714, %v375_v19  ;;  %118 = vst.msk [vmem:[#allocation2 + $0x18] sm:$0xff] %vm114_vm6, %v1279_v46  ;;  %v437_v55 = vpop.f32.mrf.mxu3 }
  0xe1   : > { %v354_v23 = vpop.f32.mrf.mxu0  ;;  %119 = vst.msk [vmem:[#allocation2 + $0x20] sm:$0xff] %vm114_vm6, %v1279_v46 }
  0xe2   : > { %v1198_v28 = vpop.eup %1197  ;;  %v530_v29 = vmul.f32 1.442695, %v1120_v21  ;;  %v1106_v32 = vadd.f32 -14.285714, %v354_v23  ;;  %v590_v23 = vadd.s32 %v1566_v50, %v573_v39  ;;  %120 = vst.msk [vmem:[#allocation2 + $0x28] sm:$0xff] %vm114_vm6, %v1279_v46 }
  0xe3   : > { %v709_v33 = vsel %vm1608_vm10, %v1198_v28, 0.0  ;;  %vm615_vm10 = vcmp.ne.s32.totalorder %v588_v7, %v1574_v54  ;;  %121 = vst.msk [vmem:[#allocation2 + $0x30] sm:$0xff] %vm114_vm6, %v1279_v46 }
  0xe4   : > { %v1200_v36 = vpop.eup %1199  ;;  %1201 = vpow2.f32 %v530_v29  ;;  %v502_v26 = vmul.f32 1.442695, %v1106_v32  ;;  %vm653_vm0 = vmand %vm615_vm10, %vm637_vm2  ;;  %v581_v29 = vadd.s32 120, %v1562_v49  ;;  %122 = vst.msk [vmem:[#allocation2 + $0x38] sm:$0xff] %vm114_vm6, %v1279_v46 }
  0xe5   : > { %v695_v37 = vsel %vm647_vm11, %v1200_v36, 0.0  ;;  %vm617_vm11 = vcmp.ne.s32.totalorder %v589_v12, %v1574_v54  ;;  %123 = vst.msk [vmem:[#allocation2 + $0x40] sm:$0xff] %vm114_vm6, %v1279_v46 }
  0xe6   : > { %751 = vadd.xlane.f32.xlu0 %v709_v33  ;;  %730 = vadd.xlane.f32.xlu1 %v695_v37  ;;  %1203 = vpow2.f32 %v502_v26  ;;  %vm655_vm12 = vmand %vm617_vm11, %vm637_vm2  ;;  %v598_v37 = vadd.s32 %v1566_v50, %v581_v29  ;;  %124 = vst.msk [vmem:[#allocation2 + $0x48] sm:$0xff] %vm114_vm6, %v1279_v46 }
  0xe7   : > { %v378_v41 = vpop.f32.mrf.mxu2  ;;  %125 = vst.msk [vmem:[#allocation2 + $0x50] sm:$0xff] %vm114_vm6, %v1279_v46 }
  0xe8   : > { %v1122_v43 = vadd.f32 -14.285714, %v378_v41  ;;  %126 = vst.msk [vmem:[#allocation2 + $0x58] sm:$0xff] %vm114_vm6, %v1279_v46  ;;  %v440_v61 = vpop.f32.mrf.mxu3 }
  0xe9   : > { %v357_v45 = vpop.f32.mrf.mxu0  ;;  %127 = vst.msk [vmem:[#allocation2 + $0x60] sm:$0xff] %vm114_vm6, %v1279_v46 }
  0xea   : > { %v1202_v47 = vpop.eup %1201  ;;  %v534_v48 = vmul.f32 1.442695, %v1122_v43  ;;  %v1108_v51 = vadd.f32 -14.285714, %v357_v45  ;;  %128 = vst.msk [vmem:[#allocation2 + $0x68] sm:$0xff] %vm114_vm6, %v1279_v46 }
  0xeb   : > { %v711_v52 = vsel %vm1634_vm15, %v1202_v47, 0.0  ;;  %vm619_vm15 = vcmp.ne.s32.totalorder %v590_v23, %v1574_v54  ;;  %129 = vst.msk [vmem:[#allocation2 + $0x70] sm:$0xff] %vm114_vm6, %v1279_v46  ;;  %v675_v47 = vld [vmem:[#allocation2] sm:$0xff] }
  0xec   : > { %1205 = vpow2.f32 %v534_v48  ;;  %v506_v57 = vmul.f32 1.442695, %v1108_v51  ;;  %v1204_v59 = vpop.eup %1203  ;;  %vm657_vm3 = vmand %vm619_vm15, %vm637_vm2  ;;  %130 = vst.msk [vmem:[#allocation2 + $0x78] sm:$0xff] %vm114_vm6, %v1279_v46  ;;  %v683_v53 = vld [vmem:[#allocation2 + $0x40] sm:$0xff]  ;;  %v680_v46 = vld [vmem:[#allocation2 + $0x28] sm:$0xff] }
  0xed   : > { %v697_v2 = vsel %vm649_vm5, %v1204_v59, 0.0 }
  0xee   : > { %754 = vadd.xlane.f32.xlu1 %v711_v52  ;;  %1207 = vpow2.f32 %v506_v57  ;;  %v676_v57 = vld [vmem:[#allocation2 + $0x8] sm:$0xff] }
  0xef   : > { %v381_v58 = vpop.f32.mrf.mxu2 }
  0xf0   : > { %v1124_v31 = vadd.f32 -14.285714, %v381_v58  ;;  %v443_v7 = vpop.f32.mrf.mxu3 }
  0xf1   : > { %v360_v60 = vpop.f32.mrf.mxu0 }
  0xf2   : > { %v1206_v62 = vpop.eup %1205  ;;  %v1110_v63 = vadd.f32 -14.285714, %v360_v60  ;;  %v538_v0 = vmul.f32 1.442695, %v1124_v31 }
  0xf3   : > { %v713_v1 = vsel %vm665_vm4, %v1206_v62, 0.0  ;;  %vm635_vm4 = vcmp.ne.s32.totalorder %v598_v37, %v1574_v54  ;;  %v410_v54 = vpop.f32.mrf.mxu1  ;;  %v684_v62 = vld [vmem:[#allocation2 + $0x48] sm:$0xff] }
  0xf4   : > { %1209 = vpow2.f32 %v538_v0  ;;  %757 = vadd.xlane.f32.xlu2 %v713_v1  ;;  %v510_v4 = vmul.f32 1.442695, %v1110_v63  ;;  %v1208_v6 = vpop.eup %1207  ;;  %vm673_vm5 = vmand %vm635_vm4, %vm637_vm2  ;;  %v677_v63 = vld [vmem:[#allocation2 + $0x10] sm:$0xff] }
  0xf5   : > { %v699_v10 = vsel %vm651_vm8, %v1208_v6, 0.0 }
  0xf6   : > { %733 = vadd.xlane.f32.xlu1 %v697_v2  ;;  %1211 = vpow2.f32 %v510_v4 }
  0xf7   : > { %v384_v5 = vpop.f32.mrf.mxu2 }
  0xf8   : > { %v1126_v21 = vadd.f32 -14.285714, %v384_v5 }
  0xf9   : > { %v363_v34 = vpop.f32.mrf.mxu0 }
  0xfa   : > { %v1210_v8 = vpop.eup %1209  ;;  %v1112_v9 = vadd.f32 -14.285714, %v363_v34  ;;  %v542_v32 = vmul.f32 1.442695, %v1126_v21 }
  0xfb   : > { %v715_v11 = vsel %vm667_vm9, %v1210_v8, 0.0  ;;  %v413_v48 = vpop.f32.mrf.mxu1  ;;  %v685_v8 = vld [vmem:[#allocation2 + $0x50] sm:$0xff] }
  0xfc   : > { %v514_v13 = vmul.f32 1.442695, %v1112_v9  ;;  %736 = vadd.xlane.f32.xlu2 %v699_v10  ;;  %760 = vadd.xlane.f32.xlu0 %v715_v11  ;;  %v1212_v16 = vpop.eup %1211 }
  0xfd   : > { %v701_v22 = vsel %vm653_vm0, %v1212_v16, 0.0 }
  0xfe   : > { %1213 = vpow2.f32 %v514_v13 }
  0xff   : > { %v387_v15 = vpop.f32.mrf.mxu2 }
 0x100   : > { %v1128_v17 = vadd.f32 -14.285714, %v387_v15 }
 0x101   : > { %v366_v38 = vpop.f32.mrf.mxu0 }
 0x102   : > { %v1114_v19 = vadd.f32 -14.285714, %v366_v38  ;;  %v546_v20 = vmul.f32 1.442695, %v1128_v17  ;;  %v686_v17 = vld [vmem:[#allocation2 + $0x58] sm:$0xff]  ;;  %v446_v38 = vpop.f32.mrf.mxu3 }
 0x103   : > { %v416_v58 = vpop.f32.mrf.mxu1 }
 0x104   : > { %v1214_v24 = vpop.eup %1213  ;;  %v518_v25 = vmul.f32 1.442695, %v1114_v19  ;;  %1215 = vpow2.f32 %v546_v20  ;;  %739 = vadd.xlane.f32.xlu2 %v701_v22  ;;  %v678_v19 = vld [vmem:[#allocation2 + $0x18] sm:$0xff] }
 0x105   : > { %v703_v28 = vsel %vm655_vm12, %v1214_v24, 0.0 }
 0x106   : > { %1217 = vpow2.f32 %v518_v25  ;;  %742 = vadd.xlane.f32.xlu0 %v703_v28 }
 0x107   : > { %v390_v33 = vpop.f32.mrf.mxu2  ;;  %1219 = vpow2.f32 %v542_v32 }
 0x108   : > { %v1130_v36 = vadd.f32 -14.285714, %v390_v33  ;;  %v679_v33 = vld [vmem:[#allocation2 + $0x20] sm:$0xff] }
 0x10a   : > { %v1216_v40 = vpop.eup %1215  ;;  %v550_v26 = vmul.f32 1.442695, %v1130_v36  ;;  %v687_v36 = vld [vmem:[#allocation2 + $0x60] sm:$0xff]  ;;  %v449_v37 = vpop.f32.mrf.mxu3 }
 0x10b   : > { %v719_v41 = vsel %vm671_vm1, %v1216_v40, 0.0  ;;  %v419_v0 = vpop.f32.mrf.mxu1 }
 0x10c   : > { %v1218_v49 = vpop.eup %1217  ;;  %1221 = vpow2.f32 %v550_v26  ;;  %766 = vadd.xlane.f32.xlu2 %v719_v41 }
 0x10d   : > { %v705_v42 = vsel %vm657_vm3, %v1218_v49, 0.0  ;;  %v1220_v43 = vpop.eup %1219 }
 0x10e   : > { %745 = vadd.xlane.f32.xlu1 %v705_v42  ;;  %v717_v45 = vsel %vm1627_vm14, %v1220_v43, 0.0 }
 0x112   : > { %v1222_v44 = vpop.eup %1221  ;;  %v452_v54 = vpop.f32.mrf.mxu3 }
 0x113   : > { %v721_v50 = vsel %vm673_vm5, %v1222_v44, 0.0  ;;  %v422_v9 = vpop.f32.mrf.mxu1 }
 0x114   : > { %769 = vadd.xlane.f32.xlu0 %v721_v50 }
 0x116   : > { %763 = vadd.xlane.f32.xlu1 %v717_v45 }
 0x11b   : > { %v425_v20 = vpop.f32.mrf.mxu1 }
 0x123   : > { %v428_v42 = vpop.f32.mrf.mxu1 }
 0x149   : > { %v725_v51 = vpop.xlane.xlu0 %724 }
 0x14a   : > { %v771_v52 = vadd.f32 %v725_v51, %v675_v47  ;;  %v681_v47 = vld [vmem:[#allocation2 + $0x30] sm:$0xff] }
 0x14c   : > { %788 = vst.msk [vmem:[#allocation2] sm:$0xff] %vm114_vm6, %v771_v52  ;;  %v431_v52 = vpop.f32.mrf.mxu1 }
 0x14f   : > { %v749_v56 = vpop.xlane.xlu2 %748 }
 0x150   : > { %v779_v31 = vadd.f32 %v749_v56, %v683_v53 }
 0x151   : > { %v728_v30 = vpop.xlane.xlu0 %727 }
 0x152   : > { %796 = vst.msk [vmem:[#allocation2 + $0x40] sm:$0xff] %vm114_vm6, %v779_v31  ;;  %v772_v59 = vadd.f32 %v728_v30, %v676_v57 }
 0x153   : > { %v907_v60 = vld [vmem:[#allocation2] sm:$0xff] }
 0x154   : > { %1223 = vlog2.f32 %v907_v60  ;;  %789 = vst.msk [vmem:[#allocation2 + $0x8] sm:$0xff] %vm114_vm6, %v772_v59  ;;  %v689_v59 = vld [vmem:[#allocation2 + $0x70] sm:$0xff]  ;;  %v455_v60 = vpop.f32.mrf.mxu3 }
 0x159   : > { %v915_v1 = vld [vmem:[#allocation2 + $0x40] sm:$0xff]  ;;  %v752_v2 = vpop.xlane.xlu0 %751  ;;  %v731_v3 = vpop.xlane.xlu1 %730 }
 0x15a   : > { %v1224_v4 = vpop.eup %1223  ;;  %1225 = vlog2.f32 %v915_v1  ;;  %v780_v5 = vadd.f32 %v752_v2, %v684_v62  ;;  %v773_v35 = vadd.f32 %v731_v3, %v677_v63  ;;  %v682_v62 = vld [vmem:[#allocation2 + $0x38] sm:$0xff] }
 0x15b   : > { %v924_v6 = vmul.f32 0.6931472, %v1224_v4  ;;  %v908_v34 = vld [vmem:[#allocation2 + $0x8] sm:$0xff] }
 0x15c   : > { %1227 = vlog2.f32 %v908_v34  ;;  %797 = vst.msk [vmem:[#allocation2 + $0x48] sm:$0xff] %vm114_vm6, %v780_v5  ;;  %v690_v34 = vld [vmem:[#allocation2 + $0x78] sm:$0xff] }
 0x15d   : > { %956 = vst.msk [vmem:[%s1720_s2] sm:$0xff] %vm114_vm6, %v924_v6 }
 0x15e   : > { %790 = vst.msk [vmem:[#allocation2 + $0x10] sm:$0xff] %vm114_vm6, %v773_v35 }
 0x160   : > { %v1226_v10 = vpop.eup %1225 }
 0x161   : > { %v940_v11 = vmul.f32 0.6931472, %v1226_v10  ;;  %v755_v12 = vpop.xlane.xlu1 %754 }
 0x162   : > { %v1228_v13 = vpop.eup %1227  ;;  %v781_v14 = vadd.f32 %v755_v12, %v685_v8  ;;  %v688_v8 = vld [vmem:[#allocation2 + $0x68] sm:$0xff] }
 0x163   : > { %964 = vst.msk [vmem:[%s1720_s2 + $0x40] sm:$0xff] %vm114_vm6, %v940_v11  ;;  %v926_v15 = vmul.f32 0.6931472, %v1228_v13  ;;  %v916_v39 = vld [vmem:[#allocation2 + $0x48] sm:$0xff] }
 0x164   : > { %1229 = vlog2.f32 %v916_v39  ;;  %798 = vst.msk [vmem:[#allocation2 + $0x50] sm:$0xff] %vm114_vm6, %v781_v14 }
 0x165   : > { %957 = vst.msk [vmem:[%s1720_s2 + $0x8] sm:$0xff] %vm114_vm6, %v926_v15  ;;  %v909_v16 = vld [vmem:[#allocation2 + $0x10] sm:$0xff] }
 0x166   : > { %1231 = vlog2.f32 %v909_v16 }
 0x167   : > { %v758_v18 = vpop.xlane.xlu2 %757 }
 0x168   : > { %v782_v21 = vadd.f32 %v758_v18, %v686_v17 }
 0x169   : > { %v734_v22 = vpop.xlane.xlu1 %733 }
 0x16a   : > { %v1230_v23 = vpop.eup %1229  ;;  %799 = vst.msk [vmem:[#allocation2 + $0x58] sm:$0xff] %vm114_vm6, %v782_v21  ;;  %v774_v24 = vadd.f32 %v734_v22, %v678_v19 }
 0x16b   : > { %v942_v25 = vmul.f32 0.6931472, %v1230_v23  ;;  %v917_v28 = vld [vmem:[#allocation2 + $0x50] sm:$0xff] }
 0x16c   : > { %v1232_v29 = vpop.eup %1231  ;;  %1233 = vlog2.f32 %v917_v28  ;;  %791 = vst.msk [vmem:[#allocation2 + $0x18] sm:$0xff] %vm114_vm6, %v774_v24 }
 0x16d   : > { %965 = vst.msk [vmem:[%s1720_s2 + $0x48] sm:$0xff] %vm114_vm6, %v942_v25  ;;  %v928_v32 = vmul.f32 0.6931472, %v1232_v29 }
 0x16f   : > { %958 = vst.msk [vmem:[%s1720_s2 + $0x10] sm:$0xff] %vm114_vm6, %v928_v32  ;;  %v737_v40 = vpop.xlane.xlu2 %736  ;;  %v761_v26 = vpop.xlane.xlu0 %760 }
 0x170   : > { %v775_v41 = vadd.f32 %v737_v40, %v679_v33  ;;  %v783_v49 = vadd.f32 %v761_v26, %v687_v36 }
 0x171   : > { %v918_v43 = vld [vmem:[#allocation2 + $0x58] sm:$0xff] }
 0x172   : > { %v1234_v44 = vpop.eup %1233  ;;  %1235 = vlog2.f32 %v918_v43  ;;  %792 = vst.msk [vmem:[#allocation2 + $0x20] sm:$0xff] %vm114_vm6, %v775_v41 }
 0x173   : > { %v944_v50 = vmul.f32 0.6931472, %v1234_v44  ;;  %v910_v45 = vld [vmem:[#allocation2 + $0x18] sm:$0xff]  ;;  %800 = vst.msk [vmem:[#allocation2 + $0x60] sm:$0xff] %vm114_vm6, %v783_v49 }
 0x174   : > { %1237 = vlog2.f32 %v910_v45 }
 0x175   : > { %966 = vst.msk [vmem:[%s1720_s2 + $0x50] sm:$0xff] %vm114_vm6, %v944_v50 }
 0x177   : > { %v740_v27 = vpop.xlane.xlu2 %739 }
 0x178   : > { %v1236_v48 = vpop.eup %1235  ;;  %v776_v51 = vadd.f32 %v740_v27, %v680_v46 }
 0x179   : > { %v946_v53 = vmul.f32 0.6931472, %v1236_v48  ;;  %v911_v55 = vld [vmem:[#allocation2 + $0x20] sm:$0xff]  ;;  %v743_v56 = vpop.xlane.xlu0 %742 }
 0x17a   : > { %v1238_v57 = vpop.eup %1237  ;;  %1239 = vlog2.f32 %v911_v55  ;;  %v919_v58 = vld [vmem:[#allocation2 + $0x60] sm:$0xff]  ;;  %793 = vst.msk [vmem:[#allocation2 + $0x28] sm:$0xff] %vm114_vm6, %v776_v51  ;;  %v777_v31 = vadd.f32 %v743_v56, %v681_v47 }
 0x17b   : > { %967 = vst.msk [vmem:[%s1720_s2 + $0x58] sm:$0xff] %vm114_vm6, %v946_v53  ;;  %v930_v30 = vmul.f32 0.6931472, %v1238_v57  ;;  %1241 = vlog2.f32 %v919_v58 }
 0x17c   : > { %794 = vst.msk [vmem:[#allocation2 + $0x30] sm:$0xff] %vm114_vm6, %v777_v31 }
 0x17d   : > { %959 = vst.msk [vmem:[%s1720_s2 + $0x18] sm:$0xff] %vm114_vm6, %v930_v30 }
 0x17f   : > { %v767_v61 = vpop.xlane.xlu2 %766 }
 0x180   : > { %v1240_v63 = vpop.eup %1239  ;;  %v785_v0 = vadd.f32 %v767_v61, %v689_v59 }
 0x181   : > { %v1242_v1 = vpop.eup %1241  ;;  %v932_v2 = vmul.f32 0.6931472, %v1240_v63  ;;  %v912_v3 = vld [vmem:[#allocation2 + $0x28] sm:$0xff]  ;;  %v746_v4 = vpop.xlane.xlu1 %745 }
 0x182   : > { %v948_v5 = vmul.f32 0.6931472, %v1242_v1  ;;  %1243 = vlog2.f32 %v912_v3  ;;  %802 = vst.msk [vmem:[#allocation2 + $0x70] sm:$0xff] %vm114_vm6, %v785_v0  ;;  %v778_v35 = vadd.f32 %v746_v4, %v682_v62 }
 0x183   : > { %960 = vst.msk [vmem:[%s1720_s2 + $0x20] sm:$0xff] %vm114_vm6, %v932_v2  ;;  %v913_v6 = vld [vmem:[#allocation2 + $0x30] sm:$0xff] }
 0x184   : > { %968 = vst.msk [vmem:[%s1720_s2 + $0x60] sm:$0xff] %vm114_vm6, %v948_v5  ;;  %1245 = vlog2.f32 %v913_v6 }
 0x185   : > { %795 = vst.msk [vmem:[#allocation2 + $0x38] sm:$0xff] %vm114_vm6, %v778_v35 }
 0x187   : > { %v770_v7 = vpop.xlane.xlu0 %769 }
 0x188   : > { %v1244_v9 = vpop.eup %1243  ;;  %v786_v10 = vadd.f32 %v770_v7, %v690_v34 }
 0x189   : > { %v934_v11 = vmul.f32 0.6931472, %v1244_v9  ;;  %v921_v12 = vld [vmem:[#allocation2 + $0x70] sm:$0xff]  ;;  %v764_v13 = vpop.xlane.xlu1 %763 }
 0x18a   : > { %v1246_v14 = vpop.eup %1245  ;;  %1247 = vlog2.f32 %v921_v12  ;;  %803 = vst.msk [vmem:[#allocation2 + $0x78] sm:$0xff] %vm114_vm6, %v786_v10  ;;  %v784_v15 = vadd.f32 %v764_v13, %v688_v8 }
 0x18b   : > { %961 = vst.msk [vmem:[%s1720_s2 + $0x28] sm:$0xff] %vm114_vm6, %v934_v11  ;;  %v936_v39 = vmul.f32 0.6931472, %v1246_v14 }
 0x18c   : > { %v914_v16 = vld [vmem:[#allocation2 + $0x38] sm:$0xff]  ;;  %801 = vst.msk [vmem:[#allocation2 + $0x68] sm:$0xff] %vm114_vm6, %v784_v15 }
 0x18d   : > { %962 = vst.msk [vmem:[%s1720_s2 + $0x30] sm:$0xff] %vm114_vm6, %v936_v39  ;;  %1249 = vlog2.f32 %v914_v16 }
 0x190   : > { %v1248_v17 = vpop.eup %1247 }
 0x191   : > { %v952_v38 = vmul.f32 0.6931472, %v1248_v17  ;;  %v922_v18 = vld [vmem:[#allocation2 + $0x78] sm:$0xff] }
 0x192   : > { %1251 = vlog2.f32 %v922_v18 }
 0x193   : > { %v1250_v19 = vpop.eup %1249  ;;  %970 = vst.msk [vmem:[%s1720_s2 + $0x70] sm:$0xff] %vm114_vm6, %v952_v38  ;;  %v920_v20 = vld [vmem:[#allocation2 + $0x68] sm:$0xff] }
 0x194   : > { %v938_v21 = vmul.f32 0.6931472, %v1250_v19  ;;  %1253 = vlog2.f32 %v920_v20 }
 0x196   : > { %963 = vst.msk [vmem:[%s1720_s2 + $0x38] sm:$0xff] %vm114_vm6, %v938_v21 }
 0x198   : > { %v1252_v22 = vpop.eup %1251 }
 0x199   : > { %v954_v23 = vmul.f32 0.6931472, %v1252_v22 }
 0x19a   : > { %v1254_v24 = vpop.eup %1253 }
 0x19b   : > { %971 = vst.msk [vmem:[%s1720_s2 + $0x78] sm:$0xff] %vm114_vm6, %v954_v23  ;;  %v950_v25 = vmul.f32 0.6931472, %v1254_v24 }
 0x19d   : > { %969 = vst.msk [vmem:[%s1720_s2 + $0x68] sm:$0xff] %vm114_vm6, %v950_v25 }
 0x19e PF: > { %s11_s8 = sadd.s32 1, %s1277_s8   ;;  %s1784_s6 = smov %s1273_s7 }
 0x19f   : > { %p8_p5 = scmp.ge.s32.totalorder %s11_s8, 4   ;;  %s1785_s7 = smov %s1787_s9 }
 0x1a1   :  { %10 = sbr.rel (!%p8_p5) target bundleno = 2 (0x2), region = 69 }

</bundles_post_ra>
